<compile_context>
chip_gen: v7x
topology: tpu7x:2x2x1
jax: 0.10.0
libtpu: 0.0.40
codegen_flags: <defaults>
</compile_context>

<pallas_src>
import functools

import jax
import jax.numpy as jnp
from jax.experimental import pallas as pl
from jax.experimental.pallas import tpu as pltpu


_LANE = 128
_MIB = 1024 * 1024


# ---------------------------------------------------------------------------
# Hardware-generation configuration
# ---------------------------------------------------------------------------

@functools.lru_cache(maxsize=1)
def _chip_config():
    """(block_budget_bytes, vmem_limit_bytes_or_None, two_tensorcores).

    Budgets are for the per-step *input* block; the split/concat working set
    is ~4x that (double-buffered input + both double-buffered output halves):
      v5e : 2 MiB block ->  ~8 MiB working set (default scoped VMEM 16 MiB)
      v6e : 4 MiB block -> ~16 MiB working set (default scoped VMEM 32 MiB)
      v7x : 7 MiB block -> ~28 MiB working set, vmem_limit raised to 48 MiB
            (64 MiB physical VMEM per TC).
    """
    kind = ""
    try:
        kind = jax.devices()[0].device_kind or ""
    except Exception:  # pragma: no cover - CPU / unknown backend fallback
        pass
    k = kind.lower().replace(" ", "")

    block_budget, vmem_limit, two_tc = 4 * _MIB, None, False  # default ~= v6e
    if "v5e" in k or "v5lite" in k:
        block_budget, vmem_limit, two_tc = 2 * _MIB, None, False
    elif "v6" in k:
        block_budget, vmem_limit, two_tc = 4 * _MIB, None, False
    elif "7" in k:  # v7x: 2 TCs/chip, 64 MiB VMEM/TC, ~3.2 TB/s HBM per TC
        block_budget, vmem_limit, two_tc = 7 * _MIB, 48 * _MIB, True
    elif "v4" in k or "v5" in k:  # v4 / v5p megacore: 2 TCs
        block_budget, vmem_limit, two_tc = 4 * _MIB, None, True
    return block_budget, vmem_limit, two_tc


def _compiler_params(vmem_limit):
    kwargs = dict(dimension_semantics=("parallel", "parallel"))
    if vmem_limit is not None:
        kwargs["vmem_limit_bytes"] = vmem_limit
    return pltpu.CompilerParams(**kwargs)


# ---------------------------------------------------------------------------
# Tiling selection
# ---------------------------------------------------------------------------

def _largest_divisor_le(n, cap):
    cap = max(1, min(cap, n))
    for d in range(cap, 0, -1):
        if n % d == 0:
            return d
    return 1


def _pick_lane_dim(M):
    """Lane dimension for the (R, L) view of one contiguous (batch, half) slab.

    Prefer the largest divisor of M that is a multiple of 128 and <= 2048
    (lane-dense, unmasked vst); otherwise the largest divisor <= 2048 (masked
    lanes, but VMEM stays bounded and R-tiling/pipelining still works).
    """
    upper = min(M, 16 * _LANE)
    best_any, best_128 = 1, 0
    for cand in range(1, upper + 1):
        if M % cand == 0:
            best_any = cand
            if cand % _LANE == 0:
                best_128 = cand
    return best_128 if best_128 else best_any


def _choose_tiling(B, M, itemsize, block_budget, two_tc):
    """Pick the (R, L) slab view and (b_tile, r_tile) block sizes.

    M = (C//2)*H*W elements per (batch, half) are contiguous in NCHW, so any
    (R, L) factorization is a free reshape.  b_tile | B; r_tile is
    sublane-aligned and the r grid axis uses ceil(R / r_tile) with a masked
    ragged last block.
    """
    L = _pick_lane_dim(M)
    R = M // L
    # Packed-sublane alignment: 8 rows for 4-byte, 16 for bf16, 32 for int8.
    align = max(8, 32 // max(1, itemsize))

    per_batch_block = 2 * R * L * itemsize  # one batch element, both halves
    if per_batch_block <= block_budget:
        r_tile = R
        max_b = max(1, block_budget // per_batch_block)
        b_tile = _largest_divisor_le(B, max_b)
    else:
        b_tile = 1
        budget_rows = max(align, block_budget // (2 * L * itemsize))
        r_tile = min(R, max(align, (budget_rows // align) * align))

    if two_tc:
        # Guarantee >= 2 grid steps so both TensorCores get work.
        if (B // b_tile) * (-(-R // r_tile)) < 2:
            if B >= 2:
                b_tile = _largest_divisor_le(B, B // 2)
            elif R > align:
                half = -(-R // 2)
                r_tile = ((half + align - 1) // align) * align

    return R, L, b_tile, r_tile


# ---------------------------------------------------------------------------
# Kernels (pure lane-dense copies)
# ---------------------------------------------------------------------------

def _split_kernel(x_ref, z1_ref, z2_ref):
    # x_ref: (b_tile, 2, r_tile, L);  z1_ref/z2_ref: (b_tile, r_tile, L)
    z1_ref[...] = x_ref[:, 0, :, :]
    z2_ref[...] = x_ref[:, 1, :, :]


def _concat_kernel(z1_ref, z2_ref, z_ref):
    # z1_ref/z2_ref: (b_tile, r_tile, L);  z_ref: (b_tile, 2, r_tile, L)
    z_ref[:, 0, :, :] = z1_ref[...]
    z_ref[:, 1, :, :] = z2_ref[...]


# ---------------------------------------------------------------------------
# Wrappers
# ---------------------------------------------------------------------------

@jax.jit
def split_feature_pallas(x):
    B, C, H, W = x.shape
    assert C % 2 == 0, "channel dim must be even to split"
    c_half = C // 2
    M = c_half * H * W
    block_budget, vmem_limit, two_tc = _chip_config()
    R, L, b_tile, r_tile = _choose_tiling(B, M, x.dtype.itemsize,
                                          block_budget, two_tc)
    grid = (B // b_tile, -(-R // r_tile))

    # Free reshape: each channel half is contiguous per batch element in NCHW.
    x_r = x.reshape(B, 2, R, L)

    z1_r, z2_r = pl.pallas_call(
        _split_kernel,
        out_shape=(
            jax.ShapeDtypeStruct((B, R, L), x.dtype),
            jax.ShapeDtypeStruct((B, R, L), x.dtype),
        ),
        grid_spec=pltpu.PrefetchScalarGridSpec(
            num_scalar_prefetch=0,
            grid=grid,
            in_specs=[
                pl.BlockSpec((b_tile, 2, r_tile, L), lambda b, r: (b, 0, r, 0)),
            ],
            out_specs=[
                pl.BlockSpec((b_tile, r_tile, L), lambda b, r: (b, r, 0)),
                pl.BlockSpec((b_tile, r_tile, L), lambda b, r: (b, r, 0)),
            ],
        ),
        compiler_params=_compiler_params(vmem_limit),
    )(x_r)

    return z1_r.reshape(B, c_half, H, W), z2_r.reshape(B, c_half, H, W)


@jax.jit
def concat_feature_pallas(z1, z2):
    assert z1.shape == z2.shape, "z1/z2 shape mismatch"
    assert z1.dtype == z2.dtype, "z1/z2 dtype mismatch"
    B, c_half, H, W = z1.shape
    C = 2 * c_half
    M = c_half * H * W
    block_budget, vmem_limit, two_tc = _chip_config()
    R, L, b_tile, r_tile = _choose_tiling(B, M, z1.dtype.itemsize,
                                          block_budget, two_tc)
    grid = (B // b_tile, -(-R // r_tile))

    z1_r = z1.reshape(B, R, L)
    z2_r = z2.reshape(B, R, L)

    z_r = pl.pallas_call(
        _concat_kernel,
        out_shape=jax.ShapeDtypeStruct((B, 2, R, L), z1.dtype),
        grid_spec=pltpu.PrefetchScalarGridSpec(
            num_scalar_prefetch=0,
            grid=grid,
            in_specs=[
                pl.BlockSpec((b_tile, r_tile, L), lambda b, r: (b, r, 0)),
                pl.BlockSpec((b_tile, r_tile, L), lambda b, r: (b, r, 0)),
            ],
            out_specs=pl.BlockSpec((b_tile, 2, r_tile, L),
                                   lambda b, r: (b, 0, r, 0)),
        ),
        compiler_params=_compiler_params(vmem_limit),
    )(z1_r, z2_r)

    return z_r.reshape(B, C, H, W)


class Split2dMsC:
    """JAX/Pallas port of the PyTorch Split2dMsC module.

    __init__ takes (num_channels, level) for interface parity; forward() of
    the reference module uses no learned parameters.
    """

    def __init__(self, num_channels, level=0):
        self.num_channels = num_channels
        self.level = level
        # TODO(synk): split2d_prior uses self.conv which is never defined in
        # the reference module, so there is nothing to port there.

    def forward(self, input, logdet=0.0, reverse=False, eps_std=None):
        if not reverse:
            z1, z2 = split_feature_pallas(input)
            return (z1, z2), logdet
        else:
            z1, z2 = input
            z = concat_feature_pallas(z1, z2)
            return z, logdet

    __call__ = forward


# ---------------------------------------------------------------------------
# Main
# ---------------------------------------------------------------------------

if __name__ == "__main__":
    key = jax.random.PRNGKey(0)

    # Primary check: the module's canonical small shape (f32).
    B, C, H, W = 2, 4, 16, 16
    x = jax.random.normal(key, (B, C, H, W), dtype=jnp.float32)
    module = Split2dMsC(num_channels=C, level=0)

    (z1, z2), logdet = module(x, logdet=0.0, reverse=False)
    z1 = jax.block_until_ready(z1)
    z2 = jax.block_until_ready(z2)
    ref_z1 = x[:, : C // 2, :, :]
    ref_z2 = x[:, C // 2:, :, :]
    assert z1.shape == (B, C // 2, H, W) and z2.shape == (B, C // 2, H, W)
    assert jnp.array_equal(z1, ref_z1), "z1 mismatch"
    assert jnp.array_equal(z2, ref_z2), "z2 mismatch"

    z, logdet_r = module((z1, z2), logdet=0.0, reverse=True)
    z = jax.block_until_ready(z)
    assert z.shape == (B, C, H, W)
    assert jnp.array_equal(z, x), "reverse concat mismatch"

    # Secondary check: non-128-divisible slab (exercises the fallback path).
    B2, C2, H2, W2 = 2, 6, 8, 8
    y = jax.random.normal(jax.random.PRNGKey(1), (B2, C2, H2, W2),
                          dtype=jnp.float32)
    (y1, y2), _ = Split2dMsC(C2)(y, reverse=False)
    y1 = jax.block_until_ready(y1)
    assert jnp.array_equal(y1, y[:, : C2 // 2]), "fallback z1 mismatch"
    assert jnp.array_equal(y2, y[:, C2 // 2:]), "fallback z2 mismatch"
    y_rt, _ = Split2dMsC(C2)((y1, y2), reverse=True)
    assert jnp.array_equal(jax.block_until_ready(y_rt), y), "fallback concat mismatch"

    # Tertiary check: bf16 (exercises the dtype-aware sublane alignment).
    xb = jax.random.normal(jax.random.PRNGKey(2), (B, C, H, W),
                           dtype=jnp.bfloat16)
    (b1, b2), _ = module(xb, reverse=False)
    b1 = jax.block_until_ready(b1)
    assert jnp.array_equal(b1, xb[:, : C // 2]), "bf16 z1 mismatch"
    assert jnp.array_equal(b2, xb[:, C // 2:]), "bf16 z2 mismatch"
    xb_rt, _ = module((b1, b2), reverse=True)
    assert jnp.array_equal(jax.block_until_ready(xb_rt), xb), "bf16 concat mismatch"

    print("KERNEL_OK")
</pallas_src>

<mosaic_0001>
module attributes {stable_mosaic.version = 11 : i64} {
  func.func @_split_kernel(%arg0: i32, %arg1: i32, %arg2: memref<2x2x1x512xf32, #tpu.memory_space<vmem>>, %arg3: memref<2x1x512xf32, #tpu.memory_space<vmem>>, %arg4: memref<2x1x512xf32, #tpu.memory_space<vmem>>) attributes {dimension_semantics = [#tpu.dimension_semantics<parallel>, #tpu.dimension_semantics<parallel>], iteration_bounds = array<i64: 1, 1>, scalar_prefetch = 0 : i64, scratch_operands = 0 : i64, tpu.core_type = #tpu.core_type<tc>, window_params = [{transform_indices = @transform_0, window_bounds = array<i64: 2, 2, 1, 512>}, {transform_indices = @transform_1, window_bounds = array<i64: 2, 1, 512>}, {transform_indices = @transform_2, window_bounds = array<i64: 2, 1, 512>}]} {
    %c0 = arith.constant 0 : index
    %c0_0 = arith.constant 0 : index
    %c0_1 = arith.constant 0 : index
    %c0_2 = arith.constant 0 : index
    %0 = vector.load %arg2[%c0, %c0_0, %c0_1, %c0_2] : memref<2x2x1x512xf32, #tpu.memory_space<vmem>>, vector<2x1x1x512xf32>
    %1 = vector.shape_cast %0 : vector<2x1x1x512xf32> to vector<2x1x512xf32>
    %c0_3 = arith.constant 0 : index
    %c0_4 = arith.constant 0 : index
    %c0_5 = arith.constant 0 : index
    %2 = vector.load %arg3[%c0_3, %c0_4, %c0_5] : memref<2x1x512xf32, #tpu.memory_space<vmem>>, vector<2x1x512xf32>
    tpu.vector_store %arg3[%c0_3, %c0_4, %c0_5], %1 {strides = array<i32>} : memref<2x1x512xf32, #tpu.memory_space<vmem>>, vector<2x1x512xf32>,
    %c0_6 = arith.constant 0 : index
    %c1 = arith.constant 1 : index
    %c0_7 = arith.constant 0 : index
    %c0_8 = arith.constant 0 : index
    %3 = vector.load %arg2[%c0_6, %c1, %c0_7, %c0_8] : memref<2x2x1x512xf32, #tpu.memory_space<vmem>>, vector<2x1x1x512xf32>
    %4 = vector.shape_cast %3 : vector<2x1x1x512xf32> to vector<2x1x512xf32>
    %c0_9 = arith.constant 0 : index
    %c0_10 = arith.constant 0 : index
    %c0_11 = arith.constant 0 : index
    %5 = vector.load %arg4[%c0_9, %c0_10, %c0_11] : memref<2x1x512xf32, #tpu.memory_space<vmem>>, vector<2x1x512xf32>
    tpu.vector_store %arg4[%c0_9, %c0_10, %c0_11], %4 {strides = array<i32>} : memref<2x1x512xf32, #tpu.memory_space<vmem>>, vector<2x1x512xf32>,
    return
  }
  func.func @transform_0(%arg0: i32, %arg1: i32) -> (i32, i32, i32, i32) {
    %c0_i32 = arith.constant 0 : i32
    %c0_i32_0 = arith.constant 0 : i32
    %c0_i32_1 = arith.constant 0 : i32
    return %arg0, %c0_i32, %arg1, %c0_i32_0 : i32, i32, i32, i32
  }
  func.func @transform_1(%arg0: i32, %arg1: i32) -> (i32, i32, i32) {
    %c0_i32 = arith.constant 0 : i32
    %c0_i32_0 = arith.constant 0 : i32
    return %arg0, %arg1, %c0_i32 : i32, i32, i32
  }
  func.func @transform_2(%arg0: i32, %arg1: i32) -> (i32, i32, i32) {
    %c0_i32 = arith.constant 0 : i32
    %c0_i32_0 = arith.constant 0 : i32
    return %arg0, %arg1, %c0_i32 : i32, i32, i32
  }
}

</mosaic_0001>

<bundles_post_ra>
// kernel: split_feature_pallas.1
= control target key start
LH: loop header
LB: loop body
LE: loop exit
PB: predicated region body
PF: predicated region fallthrough
CT: control target
= control target key end

     0   :  { %v12_v0 = vlaneseq  ;;  %s72_s0 = inlined_call_operand.vmem [shape: f32[2,2,1,512], index: 0, kind: input, shape index: {}]   ;;  %s73_s1 = inlined_call_operand.vmem [shape: f32[2,1,512], index: 1, kind: output, shape index: {0}]   ;;  %s74_s2 = inlined_call_operand.vmem [shape: f32[2,1,512], index: 2, kind: output, shape index: {1}]  }
   0x1   :  { %v10_v1 = vld [vmem:[%s72_s0] sm:$0xf]  ;;  %v11_v2 = vld [vmem:[%s72_s0 + $0x8] sm:$0xf]  ;;  %v31_v3 = vld [vmem:[%s72_s0 + $0x4] sm:$0xf] }
   0x2   :  { %vm14_vm0 = vcmp.lt.s32.totalorder %v12_v0, 512  ;;  %v32_v4 = vld [vmem:[%s72_s0 + $0xc] sm:$0xf] }
   0x3   :  { %16 = vst.msk [vmem:[%s73_s1] sm:$0xf] %vm14_vm0, %v10_v1  ;;  %17 = vst.msk [vmem:[%s73_s1 + $0x4] sm:$0xf] %vm14_vm0, %v11_v2 }
   0x4   :  { %21 = vst.msk [vmem:[%s74_s2] sm:$0xf] %vm14_vm0, %v31_v3  ;;  %22 = vst.msk [vmem:[%s74_s2 + $0x4] sm:$0xf] %vm14_vm0, %v32_v4 }

</bundles_post_ra>
